<compile_context>
chip_gen: v7x
topology: tpu7x:2x2x1
jax: 0.10.0
libtpu: 0.0.40
codegen_flags: <defaults>
</compile_context>

<pallas_src>
import functools

import jax
import jax.numpy as jnp
from jax.experimental import pallas as pl
from jax.experimental.pallas import tpu as pltpu


def _outconv_kernel(x_ref, w_ref, b_ref, o_ref, *, use_mxu):
    # x_ref: (C_in, TL)  one batch element's channels x lane tile of pixels
    # w_ref: (C_out, C_in) full weight (resident across the grid)
    # b_ref: (C_out, 1)    full bias
    # o_ref: (C_out, TL)   lane-dense output tile
    x = x_ref[...]
    w = w_ref[...]
    if use_mxu:
        acc = jnp.dot(w, x, preferred_element_type=jnp.float32)
    else:
        # Channel counts are tiny and static: unrolled VPU FMA
        # (outer-product accumulate) keeps everything off the MXU.
        xf = x.astype(jnp.float32)
        wf = w.astype(jnp.float32)
        c_in = xf.shape[0]
        acc = wf[:, 0:1] * xf[0:1, :]
        for c in range(1, c_in):
            acc = acc + wf[:, c:c + 1] * xf[c:c + 1, :]
    o_ref[...] = (acc + b_ref[...].astype(jnp.float32)).astype(o_ref.dtype)


def outconv_pallas(x_nchw, weight, bias, *, lane_tile=8192,
                   vmem_limit_bytes=32 * 1024 * 1024):
    """1x1 conv. x_nchw: (N, C_in, H, W); weight: (C_out, C_in, 1, 1); bias: (C_out,)."""
    N, C_in, H, W = x_nchw.shape
    C_out = weight.shape[0]
    HW = H * W

    # Free reshapes only -- no NHWC transposes.
    x3 = x_nchw.reshape(N, C_in, HW)
    w_mat = weight.reshape(C_out, C_in)
    b_mat = bias.reshape(C_out, 1)

    # Lane-axis tile: power of two, >=128, clamped to the spatial extent and to
    # a conservative VMEM budget (double-buffered in+out tiles) so it fits even
    # v7x's 64 MiB physical / 32 MiB default-scoped VMEM with headroom.
    itemsize = jnp.dtype(x_nchw.dtype).itemsize
    tl = min(int(lane_tile), pl.next_power_of_2(max(HW, 128)))
    vmem_budget = 8 * 1024 * 1024
    while tl > 128 and 2 * (C_in + C_out) * tl * itemsize > vmem_budget:
        tl //= 2

    HW_p = pl.cdiv(HW, tl) * tl
    if HW_p != HW:
        # Ragged tail: pad the flattened spatial axis; padding is sliced off below.
        x3 = jnp.pad(x3, ((0, 0), (0, 0), (0, HW_p - HW)))

    grid = (N, HW_p // tl)
    use_mxu = C_in > 8  # tiny reductions stay on the VPU; big ones use the MXU

    out3 = pl.pallas_call(
        functools.partial(_outconv_kernel, use_mxu=use_mxu),
        out_shape=jax.ShapeDtypeStruct((N, C_out, HW_p), x_nchw.dtype),
        grid_spec=pltpu.PrefetchScalarGridSpec(
            num_scalar_prefetch=0,
            grid=grid,
            in_specs=[
                # x: one batch element, all input channels, one lane tile.
                pl.BlockSpec((pl.Squeezed(), C_in, tl), lambda n, j: (n, 0, j)),
                # weight / bias: whole (tiny) arrays, same block every step.
                pl.BlockSpec((C_out, C_in), lambda n, j: (0, 0)),
                pl.BlockSpec((C_out, 1), lambda n, j: (0, 0)),
            ],
            out_specs=pl.BlockSpec((pl.Squeezed(), C_out, tl),
                                   lambda n, j: (n, 0, j)),
        ),
        compiler_params=pltpu.CompilerParams(
            dimension_semantics=("parallel", "parallel"),
            vmem_limit_bytes=vmem_limit_bytes),
    )(x3, w_mat, b_mat)

    if HW_p != HW:
        out3 = out3[:, :, :HW]
    return out3.reshape(N, C_out, H, W)


if __name__ == "__main__":
    key = jax.random.PRNGKey(0)
    k_x, k_w, k_b = jax.random.split(key, 3)

    N, C_in, H, W = 2, 4, 16, 16
    C_out = 3

    x = jax.random.normal(k_x, (N, C_in, H, W), dtype=jnp.float32)
    # Deterministic synthetic parameters (same shapes as nn.Conv2d(C_in, C_out, 1)).
    weight = jax.random.normal(k_w, (C_out, C_in, 1, 1), dtype=jnp.float32) * 0.1
    bias = jax.random.normal(k_b, (C_out,), dtype=jnp.float32) * 0.1

    out = outconv_pallas(x, weight, bias)
    out = jax.block_until_ready(out)

    # Reference: 1x1 conv == channel matmul, computed in plain JAX.
    ref = jnp.einsum("nchw,oc->nohw", x, weight.reshape(C_out, C_in)) \
        + bias.reshape(1, C_out, 1, 1)

    assert out.shape == (N, C_out, H, W)
    assert jnp.allclose(out, ref, atol=1e-5, rtol=1e-5)
    print("KERNEL_OK")
</pallas_src>

<mosaic_0001>
module attributes {stable_mosaic.version = 11 : i64} {
  func.func @_outconv_kernel(%arg0: i32, %arg1: i32, %arg2: memref<1x4x256xf32, #tpu.memory_space<vmem>>, %arg3: memref<3x4xf32, #tpu.memory_space<vmem>>, %arg4: memref<3x1xf32, #tpu.memory_space<vmem>>, %arg5: memref<1x3x256xf32, #tpu.memory_space<vmem>>) attributes {dimension_semantics = [#tpu.dimension_semantics<parallel>, #tpu.dimension_semantics<parallel>], iteration_bounds = array<i64: 2, 1>, scalar_prefetch = 0 : i64, scratch_operands = 0 : i64, tpu.core_type = #tpu.core_type<tc>, window_params = [{transform_indices = @transform_0, window_bounds = array<i64: 1, 4, 256>}, {pipeline_mode = #tpu.pipeline_mode<synchronous>, transform_indices = @transform_1, window_bounds = array<i64: 3, 4>}, {pipeline_mode = #tpu.pipeline_mode<synchronous>, transform_indices = @transform_2, window_bounds = array<i64: 3, 1>}, {transform_indices = @transform_3, window_bounds = array<i64: 1, 3, 256>}]} {
    %c0 = arith.constant 0 : index
    %c0_0 = arith.constant 0 : index
    %c0_1 = arith.constant 0 : index
    %0 = vector.load %arg2[%c0, %c0_0, %c0_1] : memref<1x4x256xf32, #tpu.memory_space<vmem>>, vector<1x4x256xf32>
    %1 = vector.shape_cast %0 : vector<1x4x256xf32> to vector<4x256xf32>
    %c0_2 = arith.constant 0 : index
    %c0_3 = arith.constant 0 : index
    %2 = vector.load %arg3[%c0_2, %c0_3] : memref<3x4xf32, #tpu.memory_space<vmem>>, vector<3x4xf32>
    %3 = vector.extract_strided_slice %2 {offsets = [0, 0], sizes = [3, 1], strides = [1, 1]} : vector<3x4xf32> to vector<3x1xf32>
    %4 = vector.extract_strided_slice %1 {offsets = [0, 0], sizes = [1, 256], strides = [1, 1]} : vector<4x256xf32> to vector<1x256xf32>
    %5 = vector.broadcast %3 : vector<3x1xf32> to vector<3x256xf32>
    %6 = vector.broadcast %4 : vector<1x256xf32> to vector<3x256xf32>
    %7 = arith.mulf %5, %6 : vector<3x256xf32>
    %8 = vector.extract_strided_slice %2 {offsets = [0, 1], sizes = [3, 1], strides = [1, 1]} : vector<3x4xf32> to vector<3x1xf32>
    %9 = vector.extract_strided_slice %1 {offsets = [1, 0], sizes = [1, 256], strides = [1, 1]} : vector<4x256xf32> to vector<1x256xf32>
    %10 = vector.broadcast %8 : vector<3x1xf32> to vector<3x256xf32>
    %11 = vector.broadcast %9 : vector<1x256xf32> to vector<3x256xf32>
    %12 = arith.mulf %10, %11 : vector<3x256xf32>
    %13 = arith.addf %7, %12 : vector<3x256xf32>
    %14 = vector.extract_strided_slice %2 {offsets = [0, 2], sizes = [3, 1], strides = [1, 1]} : vector<3x4xf32> to vector<3x1xf32>
    %15 = vector.extract_strided_slice %1 {offsets = [2, 0], sizes = [1, 256], strides = [1, 1]} : vector<4x256xf32> to vector<1x256xf32>
    %16 = vector.broadcast %14 : vector<3x1xf32> to vector<3x256xf32>
    %17 = vector.broadcast %15 : vector<1x256xf32> to vector<3x256xf32>
    %18 = arith.mulf %16, %17 : vector<3x256xf32>
    %19 = arith.addf %13, %18 : vector<3x256xf32>
    %20 = vector.extract_strided_slice %2 {offsets = [0, 3], sizes = [3, 1], strides = [1, 1]} : vector<3x4xf32> to vector<3x1xf32>
    %21 = vector.extract_strided_slice %1 {offsets = [3, 0], sizes = [1, 256], strides = [1, 1]} : vector<4x256xf32> to vector<1x256xf32>
    %22 = vector.broadcast %20 : vector<3x1xf32> to vector<3x256xf32>
    %23 = vector.broadcast %21 : vector<1x256xf32> to vector<3x256xf32>
    %24 = arith.mulf %22, %23 : vector<3x256xf32>
    %25 = arith.addf %19, %24 : vector<3x256xf32>
    %c0_4 = arith.constant 0 : index
    %c0_5 = arith.constant 0 : index
    %26 = vector.load %arg4[%c0_4, %c0_5] : memref<3x1xf32, #tpu.memory_space<vmem>>, vector<3x1xf32>
    %27 = vector.broadcast %26 : vector<3x1xf32> to vector<3x256xf32>
    %28 = arith.addf %25, %27 : vector<3x256xf32>
    %c0_6 = arith.constant 0 : index
    %c0_7 = arith.constant 0 : index
    %c0_8 = arith.constant 0 : index
    %29 = vector.load %arg5[%c0_6, %c0_7, %c0_8] : memref<1x3x256xf32, #tpu.memory_space<vmem>>, vector<1x3x256xf32>
    %30 = vector.shape_cast %29 : vector<1x3x256xf32> to vector<3x256xf32>
    %31 = vector.shape_cast %28 : vector<3x256xf32> to vector<1x3x256xf32>
    tpu.vector_store %arg5[%c0_6, %c0_7, %c0_8], %31 {strides = array<i32>} : memref<1x3x256xf32, #tpu.memory_space<vmem>>, vector<1x3x256xf32>,
    return
  }
  func.func @transform_0(%arg0: i32, %arg1: i32) -> (i32, i32, i32) {
    %c0_i32 = arith.constant 0 : i32
    %c0_i32_0 = arith.constant 0 : i32
    return %arg0, %c0_i32, %arg1 : i32, i32, i32
  }
  func.func @transform_1(%arg0: i32, %arg1: i32) -> (i32, i32) {
    %c0_i32 = arith.constant 0 : i32
    %c0_i32_0 = arith.constant 0 : i32
    %c0_i32_1 = arith.constant 0 : i32
    return %c0_i32, %c0_i32_0 : i32, i32
  }
  func.func @transform_2(%arg0: i32, %arg1: i32) -> (i32, i32) {
    %c0_i32 = arith.constant 0 : i32
    %c0_i32_0 = arith.constant 0 : i32
    %c0_i32_1 = arith.constant 0 : i32
    return %c0_i32, %c0_i32_0 : i32, i32
  }
  func.func @transform_3(%arg0: i32, %arg1: i32) -> (i32, i32, i32) {
    %c0_i32 = arith.constant 0 : i32
    %c0_i32_0 = arith.constant 0 : i32
    return %arg0, %c0_i32, %arg1 : i32, i32, i32
  }
}

</mosaic_0001>

<bundles_post_ra>
// kernel: tpu_custom_call.1
= control target key start
LH: loop header
LB: loop body
LE: loop exit
PB: predicated region body
PF: predicated region fallthrough
CT: control target
= control target key end

     0   :  { %8 = vsyncpa [#allocation3], 0  ;;  %s749_s0 = inlined_call_operand.hbm [shape: f32[2,4,256], index: 0, kind: input, shape index: {}]   ;;  %s750_s1 = inlined_call_operand.vmem [shape: f32[3,4], index: 1, kind: input, shape index: {}]   ;;  %s751_s2 = inlined_call_operand.vmem [shape: f32[3,1], index: 2, kind: input, shape index: {}]   ;;  %s752_s3 = inlined_call_operand.vmem [shape: f32[2,3,256], index: 3, kind: output, shape index: {}]  }
   0x1   :  { %10 = vsyncpa [#allocation3 + $0x1], 0  ;;  %s618_s12 = smov 0   ;;  %s620_s13 = smov 0  }
   0x2   :  { %s622_s14 = smov 0   ;;  %s624_s15 = smov 0  }
   0x3   :  { %s626_s16 = smov 0   ;;  %s628_s17 = smov 0  }
   0x4 LB: > { %s431_s18 = sadd.s32 4294967295, %s591_s17   ;;  %s28_s19 = sadd.s32 1, %s587_s16  ;;  %s591_s17 = sphi %s628_s17, %s16_s17   ;;  %s587_s16 = sphi %s626_s16, %s762_s16   ;;  %s583_s15 = sphi %s624_s15, %s761_s15   ;;  %s579_s14 = sphi %s622_s14, %s760_s14   ;;  %s575_s13 = sphi %s620_s13, %s759_s13   ;;  %s571_s12 = sphi %s618_s12, %s758_s12  }
   0x5   : > { %p30_p0 = scmp.ge.s32.totalorder %s28_s19, 2  ;;  %s37_s20 = sadd.s32 1, %s579_s14 }
   0x6   : > { %p44_p1 = scmp.ne.s32.totalorder %s579_s14, %s575_s13  ;;  %p45_p2 = scmp.eq.s32.totalorder %s591_s17, 0 }
   0x7   : > { %s764_s19 = smov (%p30_p0, %s28_s19), 0  ;;  %p50_p4 = scmp.ne.s32.totalorder %s575_s13, %s571_s12 }
   0x8   : > { %p654_p3 = por %p45_p2, %p44_p1  ;;  %s32_s22 = ssub.s32 %s587_s16, %s764_s19 }
   0x9   : > { %p51_p5 = scmp.eq.s32.totalorder %s431_s18, 0  ;;  %p35_p6 = scmp.eq.s32.totalorder %s32_s22, 0 }
   0xa   : > { %p452_p8 = scmp.lt.s32.totalorder %s591_s17, 2  ;;  %s150_s25 = sand.u32 1, %s579_s14  }
   0xb   : > { %p661_p7 = por %p51_p5, %p50_p4  ;;  %s444_s26 = sshll.u32 %s587_s16, 7 }
   0xc   : > { %s667_s24 = scalar_select %p35_p6, %s579_s14, %s37_s20  }
   0xd   : > { %s435_s27 = sshll.u32 %s150_s25, 3  ;;  %s674_s30 = scalar_lea.hbm %s749_s0, %s444_s26 }
   0xe   : > { %s154_s4 = scalar_lea.vmem [#allocation2], %s435_s27  ;;  %p678_p9 = pnand %p452_p8, %p654_p3 }
   0xf   : > { %s164_s5 = sshll.u32 %s154_s4, 4  ;;  %s151_s7 = scalar_lea.sflag [#allocation3], %s150_s25  ;;  %s682_s5 = int_to_ptr.vmem [resolvable:$true] %s164_s5 }
  0x10   : > { %s511_s8 = scalar_lea.hbm %s674_s30, 128  ;;  %p513_p13 = pneg %p678_p9 }
  0x11   : > { %p512_p12 = scmp.ne.s32.totalorder %s674_s30, %s511_s8  ;;  %s516_s11 = scalar_lea.hbm %s749_s0, 256 }
  0x12   : > { %p517_p2 = scmp.lt.u32.totalorder %s674_s30, %s749_s0  ;;  %p518_p3 = scmp.lt.u32.totalorder %s516_s11, %s511_s8 }
  0x13   : > { %p514_p0 = pnand %p513_p13, %p512_p12  ;;  %p520_p5 = scmp.lt.u32.totalorder %s511_s8, %s674_s30 }
  0x14   : > { %p519_p4 = por %p518_p3, %p517_p2 }
  0x15   : > { %p515_p1 = pneg %p514_p0 }
  0x16   : > { %p521_p6 = por %p520_p5, %p519_p4 }
  0x18   : > { %p522_p8 = pnand %p521_p6, %p515_p1 }
  0x1a   : > { %525 = shalt.err (!%p522_p8)
}
  0x1b   : > { %s526_s20 = scalar_lea.vmem %s682_s5, 128  ;;  %s593_s21 = smov [#allocation2]  }
  0x1c   : > { %p527_p12 = scmp.ne.s32.totalorder %s682_s5, %s526_s20  ;;  %s531_s22 = sshll.u32 %s593_s21, 4  ;;  %s532_s22 = int_to_ptr.vmem [resolvable:$false] %s531_s22 }
  0x1d   : > { %s533_s25 = scalar_lea.vmem %s532_s22, 256  ;;  %p534_p11 = scmp.lt.s32.totalorder %s682_s5, %s532_s22 }
  0x1e   : > { %p529_p0 = pnand %p527_p12, %p513_p13  ;;  %p535_p2 = scmp.lt.s32.totalorder %s533_s25, %s526_s20 }
  0x20   : > { %p530_p10 = pneg %p529_p0  ;;  %p536_p3 = por %p535_p2, %p534_p11 }
  0x22   : > { %p537_p4 = pnand %p536_p3, %p530_p10 }
  0x24   : > { %540 = shalt.err (!%p537_p4)
}
  0x25   : > { %451 = dma.hbm_to_vmem [thread:$0]  (!%p678_p9), %s674_s30, 128, %s682_s5, %s151_s7  }
  0x26   : > { %p756_p1 = scmp.lt.s32.totalorder %s591_s17, 3  ;;  %p757_p5 = scmp.ge.s32.totalorder %s591_s17, 1 }
  0x28   : > { %p170_p13 = pnand %p757_p5, %p756_p1 }
  0x29   : > { %s175_s26 = sand.u32 (!%p170_p13), 1, %s575_s13  }
  0x2a   : > { %173 = sbr.rel (%p170_p13) target bundleno = 198 (0xc6), region = 32  ;;  %s439_s27 = sshll.u32 (!%p170_p13), %s175_s26, 3 }
  0x2b   : > { %s176_s28 = scalar_lea.sflag (!%p170_p13), [#allocation3], %s175_s26  ;;  %s179_s29 = scalar_lea.vmem (!%p170_p13), [#allocation2], %s439_s27 }
  0x31   : > { %566 = dma.done.wait (%p661_p7), %s176_s28, 128  }
  0x32   : > { %568 = vsyncadd (%p661_p7), %s176_s28, 4294967168  ;;  %v594_v0 = vmov 0   ;;  %v595_v1 = vmov 2   ;;  %v218_v2 = vld [vmem:[%s750_s1] sm:$0x7]  ;;  %v596_v3 = vmov 1   ;;  %v225_v6 = vlaneseq }
  0x33   : > { %505 = vset.pattern.permute.xlu0 %v594_v0  ;;  %507 = vset.pattern.permute.xlu1 %v595_v1  ;;  %v597_v4 = vmov 3   ;;  %v323_v5 = vld [vmem:[%s751_s2] sm:$0x7]  ;;  %p208_p7 = scmp.lt.s32.totalorder %s583_s15, 1 }
  0x34   : > { %221 = vperm.xlu0 %505, %v218_v2   ;;  %272 = vperm.xlu1 %507, %v218_v2   ;;  %v226_v7 = vshrl.u32 %v225_v6, 7  ;;  %v217_v12 = vld [vmem:[%s179_s29] sm:$0xff] }
  0x35   : > { %s766_s15 = smov (!%p208_p7, %s583_s15), 1 }
  0x36   : > { %v227_v8 = vsub.s32 0, %v226_v7  ;;  %v231_v9 = vsub.s32 4, %v226_v7  ;;  %v251_v10 = vsub.s32 1, %v226_v7  ;;  %v255_v11 = vsub.s32 5, %v226_v7  ;;  %s445_s23 = sshll.u32 %s766_s15, 3 }
  0x37   : > { %v277_v13 = vsub.s32 2, %v226_v7  ;;  %v281_v14 = vsub.s32 6, %v226_v7  ;;  %v303_v15 = vsub.s32 3, %v226_v7  ;;  %v307_v16 = vsub.s32 7, %v226_v7  ;;  %s215_s9 = scalar_lea.vmem %s752_s3, %s445_s23 }
  0x38   : > { %506 = vset.pattern.permute.xlu0 %v596_v3  ;;  %508 = vset.pattern.permute.xlu1 %v597_v4  ;;  %v228_v17 = vrot.slane %v217_v12, %v227_v8  ;;  %v232_v18 = vrot.slane %v217_v12, %v231_v9  ;;  %v252_v19 = vrot.slane %v217_v12, %v251_v10 }
  0x39   : > { %246 = vperm.xlu0 %506, %v218_v2   ;;  %298 = vperm.xlu1 %508, %v218_v2   ;;  %v256_v20 = vrot.slane %v217_v12, %v255_v11  ;;  %v278_v21 = vrot.slane %v217_v12, %v277_v13  ;;  %v282_v22 = vrot.slane %v217_v12, %v281_v14 }
  0x3a   : > { %v304_v25 = vrot.slane %v217_v12, %v303_v15  ;;  %v308_v26 = vrot.slane %v217_v12, %v307_v16  ;;  %v238_v27 = vrot.slane %v228_v17, %v227_v8  ;;  %v242_v28 = vrot.slane %v232_v18, %v227_v8 }
  0x3b   : > { %v262_v29 = vrot.slane %v252_v19, %v251_v10  ;;  %v266_v30 = vrot.slane %v256_v20, %v251_v10  ;;  %v288_v31 = vrot.slane %v278_v21, %v277_v13  ;;  %v292_v32 = vrot.slane %v282_v22, %v277_v13 }
  0x3c   : > { %v314_v33 = vrot.slane %v304_v25, %v303_v15  ;;  %v318_v34 = vrot.slane %v308_v26, %v303_v15 }
  0x3d   : > { %509 = vset.pattern.permute.xlu1 %v594_v0  ;;  %510 = vset.pattern.permute.xlu0 %v594_v0 }
  0x3e   : > { %326 = vperm.xlu1 %509, %v323_v5  }
  0xb3   : > { %v222_v23 = vpop.permute.xlu0 %221  ;;  %v273_v24 = vpop.permute.xlu1 %272 }
  0xb4   : > { %v243_v37 = vmul.f32 %v238_v27, %v222_v23  ;;  %v244_v38 = vmul.f32 %v242_v28, %v222_v23  ;;  %v293_v41 = vmul.f32 %v288_v31, %v273_v24  ;;  %v294_v42 = vmul.f32 %v292_v32, %v273_v24 }
  0xb8   : > { %v247_v35 = vpop.permute.xlu0 %246  ;;  %v299_v36 = vpop.permute.xlu1 %298 }
  0xb9   : > { %v267_v39 = vmul.f32 %v262_v29, %v247_v35  ;;  %v268_v40 = vmul.f32 %v266_v30, %v247_v35  ;;  %v319_v45 = vmul.f32 %v314_v33, %v299_v36  ;;  %v320_v46 = vmul.f32 %v318_v34, %v299_v36 }
  0xbb   : > { %v269_v43 = vadd.f32 %v267_v39, %v243_v37  ;;  %v270_v44 = vadd.f32 %v268_v40, %v244_v38 }
  0xbd   : > { %v295_v47 = vadd.f32 %v293_v41, %v269_v43  ;;  %v296_v48 = vadd.f32 %v294_v42, %v270_v44  ;;  %v327_v49 = vpop.permute.xlu1 %326 }
  0xbf   : > { %v321_v50 = vadd.f32 %v319_v45, %v295_v47  ;;  %v322_v51 = vadd.f32 %v320_v46, %v296_v48 }
  0xc1   : > { %v329_v52 = vadd.f32 %v327_v49, %v321_v50  ;;  %v330_v53 = vadd.f32 %v327_v49, %v322_v51 }
  0xc3   : > { %v333_v54 = vcombine.low %v329_v52, %v330_v53 }
  0xc5   : > { %335 = vst [vmem:[%s215_s9] sm:$0x77] %v333_v54 }
  0xc6 PF: > { %s16_s17 = sadd.s32 1, %s591_s17   ;;  %s758_s12 = smov %s575_s13 }
  0xc7   : > { %p13_p9 = scmp.ge.s32.totalorder %s16_s17, 4   ;;  %s759_s13 = smov %s579_s14 }
  0xc8   : > { %s760_s14 = smov %s667_s24  ;;  %s761_s15 = smov %s587_s16 }
  0xc9   : > { %s762_s16 = smov %s764_s19  ;;  %15 = sbr.rel (!%p13_p9) target bundleno = 4 (0x4), region = 72 }
  0xd0   :  { %366 = vsyncpa [#allocation3], 1 }
  0xd1   :  { %368 = vsyncpa [#allocation3 + $0x1], 1 }

</bundles_post_ra>
